<compile_context>
chip_gen: v5e
topology: v5e:2x2
jax: 0.10.0
libtpu: 0.0.40
codegen_flags: <defaults>
</compile_context>

<pallas_src>
import jax
import jax.numpy as jnp
from jax.experimental import pallas as pl
from jax.experimental.pallas import tpu as pltpu


def _round_up(x, m):
    return ((x + m - 1) // m) * m


def _cdiv(a, b):
    return (a + b - 1) // b


def ensemble_kernel(w_ref, xT_ref, W_ref, b_ref, oT_ref):
    """One (K-split, K-tile) step of  out^T = sum_m w[m] * (W_m @ x^T) + b.

    w_ref : SMEM [M]              ensemble weights (scalar prefetch)
    xT_ref: VMEM [tk, B]          bf16 K-tile of x^T
    W_ref : VMEM [M, NC_pad, tk]  bf16 K-tile of all M weights, lane-dense in D
    b_ref : VMEM [NC_pad, 1]      f32 pre-combined weighted bias (resident)
    oT_ref: VMEM [NC_pad, B]      f32 partial output, resident across the K axis
    """
    c = pl.program_id(0)   # K-split ("parallel": shards across TensorCores)
    k = pl.program_id(1)   # K-tile within the split ("arbitrary": reduction)
    M = W_ref.shape[0]

    @pl.when(k == 0)
    def _():
        # Fold the weighted bias into split 0's init; the other splits start
        # at zero, so the wrapper's partial-sum adds the bias exactly once.
        oT_ref[...] = jnp.where(
            c == 0,
            jnp.broadcast_to(b_ref[...], oT_ref.shape),
            jnp.zeros_like(oT_ref),
        )

    # M output-scaled MXU matmuls (no materialized VPU weight combine): the
    # big weight stream goes vld -> MXU only; accumulation is f32.
    x_t = xT_ref[...]
    acc = oT_ref[...]
    for m in range(M):
        acc = acc + w_ref[m] * jnp.dot(
            W_ref[m], x_t, preferred_element_type=jnp.float32)
    oT_ref[...] = acc


def prepare_ensemble_params(Ws, bs, *, tk=8192, n_split=2):
    """One-time packing of the static sub-model parameters (hoisted out of
    the forward path): transpose to lane-dense-along-D layout, pad, bf16-cast.

    Ws: [M, D, NC] f32;  bs: [M, NC] f32
    Returns (W_packed [M, NC_pad, D_pad] bf16, bs_pad [M, NC_pad] f32, meta).
    """
    M, D, NC = Ws.shape
    NC_pad = _round_up(NC, 16)                      # bf16 sublane packing
    tk = _round_up(min(tk, _round_up(D, 128)), 128)  # lane-aligned K tile
    nk_total = _cdiv(D, tk)
    if nk_total < n_split:                          # nothing to shard at tiny D
        n_split = 1
    nk = _cdiv(nk_total, n_split)                   # K tiles per split
    D_pad = tk * nk * n_split

    # Lane-dense along D (the long, streamed axis) => no 8x NC lane padding.
    W_packed = jnp.transpose(Ws, (0, 2, 1))                         # [M, NC, D]
    W_packed = jnp.pad(W_packed, ((0, 0), (0, NC_pad - NC), (0, D_pad - D)))
    W_packed = W_packed.astype(jnp.bfloat16)
    bs_pad = jnp.pad(bs, ((0, 0), (0, NC_pad - NC))).astype(jnp.float32)

    meta = dict(D=D, NC=NC, NC_pad=NC_pad, tk=tk, nk=nk,
                n_split=n_split, D_pad=D_pad)
    return W_packed, bs_pad, meta


def plant_disease_ensemble(x, W_packed, bs_pad, w, meta):
    """x: [B, C, H, W]  ->  [B, NC]   (== sum_m w[m] * (x_flat @ W_m + b_m))."""
    B = x.shape[0]
    D, NC, NC_pad = meta["D"], meta["NC"], meta["NC_pad"]
    tk, nk, n_split, D_pad = (meta["tk"], meta["nk"],
                              meta["n_split"], meta["D_pad"])
    M = W_packed.shape[0]

    # Per-call x prep (tiny vs. the weight stream): flatten, transpose so the
    # contraction dim is the long axis, pad D, cast to bf16 (MXU-native).
    xT = x.reshape(B, D).T                                          # [D, B]
    xT = jnp.pad(xT, ((0, D_pad - D), (0, 0))).astype(jnp.bfloat16)

    # Pre-combined weighted bias (w is a runtime parameter, but this is tiny).
    b_comb = (w.astype(jnp.float32) @ bs_pad)[:, None]              # [NC_pad, 1]

    grid_spec = pltpu.PrefetchScalarGridSpec(
        num_scalar_prefetch=1,
        grid=(n_split, nk),
        in_specs=[
            pl.BlockSpec((tk, B), lambda c, k, wv: (c * nk + k, 0)),             # x^T
            pl.BlockSpec((M, NC_pad, tk), lambda c, k, wv: (0, 0, c * nk + k)),  # W
            pl.BlockSpec((NC_pad, 1), lambda c, k, wv: (0, 0)),                  # bias
        ],
        out_specs=pl.BlockSpec((None, NC_pad, B), lambda c, k, wv: (c, 0, 0)),
    )

    partials = pl.pallas_call(
        ensemble_kernel,
        out_shape=jax.ShapeDtypeStruct((n_split, NC_pad, B), jnp.float32),
        grid_spec=grid_spec,
        compiler_params=pltpu.CompilerParams(
            # K-splits are independent (v7x dual-TC / megacore); K tiles within
            # a split accumulate into the resident f32 output block.
            dimension_semantics=("parallel", "arbitrary")),
    )(w.astype(jnp.float32), xT, W_packed, b_comb)

    # TODO(synk): on v7x, an fp8 weight stream with per-output-channel dequant
    # scales would halve weight bytes again; gated on accuracy budget.
    outT = partials.sum(axis=0)               # [NC_pad, B]  (adds the K-splits)
    return outT[:NC, :].T.astype(x.dtype)     # [B, NC]


def reference(x, Ws, bs, w):
    B = x.shape[0]
    D = Ws.shape[1]
    x_flat = x.reshape(B, D).astype(jnp.float32)
    outs = jnp.stack(
        [x_flat @ Ws[m].astype(jnp.float32) + bs[m] for m in range(Ws.shape[0])])
    return (outs * w[:, None, None]).sum(axis=0)


if __name__ == "__main__":
    # Small shapes consistent with the module: image-like NCHW input, M models.
    B, C, H, W_sp = 2, 4, 16, 16
    D = C * H * W_sp            # 1024
    NC = 16                     # number of disease classes (synthetic)
    M = 3                       # number of ensemble members

    key = jax.random.PRNGKey(0)
    kx, kw, kb = jax.random.split(key, 3)

    x = jax.random.normal(kx, (B, C, H, W_sp), dtype=jnp.float32)
    # Deterministic synthetic sub-model parameters (linear classifiers).
    Ws = jax.random.normal(kw, (M, D, NC), dtype=jnp.float32) * 0.02
    bs = jax.random.normal(kb, (M, NC), dtype=jnp.float32) * 0.1
    # nn.Parameter(torch.ones(len(models)) / len(models))
    w = jnp.ones((M,), dtype=jnp.float32) / M

    # One-time static weight packing (hoisted out of the forward path).
    W_packed, bs_pad, meta = prepare_ensemble_params(Ws, bs)

    out = plant_disease_ensemble(x, W_packed, bs_pad, w, meta)
    out = jax.block_until_ready(out)

    ref = reference(x, Ws, bs, w)
    assert out.shape == (B, NC)
    # bf16 inputs / f32 accumulation vs. pure-f32 reference.
    assert jnp.allclose(out, ref, atol=2e-2, rtol=2e-2), "mismatch vs reference"
    print("KERNEL_OK")
</pallas_src>

<mosaic_0001>
module attributes {stable_mosaic.version = 11 : i64} {
  func.func @ensemble_kernel(%arg0: i32, %arg1: i32, %arg2: memref<3xf32, #tpu.memory_space<smem>>, %arg3: memref<1024x2xbf16, #tpu.memory_space<vmem>>, %arg4: memref<3x16x1024xbf16, #tpu.memory_space<vmem>>, %arg5: memref<16x1xf32, #tpu.memory_space<vmem>>, %arg6: memref<1x16x2xf32, #tpu.memory_space<vmem>>) attributes {dimension_semantics = [#tpu.dimension_semantics<parallel>, #tpu.dimension_semantics<arbitrary>], iteration_bounds = array<i64: 1, 1>, scalar_prefetch = 1 : i64, scratch_operands = 0 : i64, tpu.core_type = #tpu.core_type<tc>, window_params = [{transform_indices = @transform_0, window_bounds = array<i64: 1024, 2>}, {transform_indices = @transform_1, window_bounds = array<i64: 3, 16, 1024>}, {pipeline_mode = #tpu.pipeline_mode<synchronous>, transform_indices = @transform_2, window_bounds = array<i64: 16, 1>}, {transform_indices = @transform_3, window_bounds = array<i64: 1, 16, 2>}]} {
    %c0_i32 = arith.constant 0 : i32
    %0 = arith.cmpi eq, %arg1, %c0_i32 : i32
    %1 = arith.extui %0 : i1 to i32
    %c0_i32_0 = arith.constant 0 : i32
    %2 = arith.cmpi ne, %1, %c0_i32_0 : i32
    scf.if %2 {
      %c0_i32_20 = arith.constant 0 : i32
      %30 = arith.cmpi eq, %arg0, %c0_i32_20 : i32
      %c0_21 = arith.constant 0 : index
      %c0_22 = arith.constant 0 : index
      %31 = vector.load %arg5[%c0_21, %c0_22] : memref<16x1xf32, #tpu.memory_space<vmem>>, vector<16x1xf32>
      %32 = vector.shape_cast %31 : vector<16x1xf32> to vector<16x1xf32>
      %33 = vector.broadcast %32 : vector<16x1xf32> to vector<16x2xf32>
      %cst_23 = arith.constant 0.000000e+00 : f32
      %34 = vector.broadcast %cst_23 : f32 to vector<16x2xf32>
      %35 = arith.select %30, %33, %34 : vector<16x2xf32>
      %c0_24 = arith.constant 0 : index
      %c0_25 = arith.constant 0 : index
      %c0_26 = arith.constant 0 : index
      %36 = vector.load %arg6[%c0_24, %c0_25, %c0_26] : memref<1x16x2xf32, #tpu.memory_space<vmem>>, vector<1x16x2xf32>
      %37 = vector.shape_cast %36 : vector<1x16x2xf32> to vector<16x2xf32>
      %38 = vector.shape_cast %35 : vector<16x2xf32> to vector<1x16x2xf32>
      tpu.vector_store %arg6[%c0_24, %c0_25, %c0_26], %38 {strides = array<i32>} : memref<1x16x2xf32, #tpu.memory_space<vmem>>, vector<1x16x2xf32>,
    } else {
    }
    %c0 = arith.constant 0 : index
    %c0_1 = arith.constant 0 : index
    %3 = vector.load %arg3[%c0, %c0_1] : memref<1024x2xbf16, #tpu.memory_space<vmem>>, vector<1024x2xbf16>
    %c0_2 = arith.constant 0 : index
    %c0_3 = arith.constant 0 : index
    %c0_4 = arith.constant 0 : index
    %4 = vector.load %arg6[%c0_2, %c0_3, %c0_4] : memref<1x16x2xf32, #tpu.memory_space<vmem>>, vector<1x16x2xf32>
    %5 = vector.shape_cast %4 : vector<1x16x2xf32> to vector<16x2xf32>
    %c0_5 = arith.constant 0 : index
    %6 = memref.load %arg2[%c0_5] : memref<3xf32, #tpu.memory_space<smem>>
    %c0_6 = arith.constant 0 : index
    %c0_7 = arith.constant 0 : index
    %c0_8 = arith.constant 0 : index
    %7 = vector.load %arg4[%c0_6, %c0_7, %c0_8] : memref<3x16x1024xbf16, #tpu.memory_space<vmem>>, vector<1x16x1024xbf16>
    %8 = vector.shape_cast %7 : vector<1x16x1024xbf16> to vector<16x1024xbf16>
    %cst = arith.constant dense<0.000000e+00> : vector<16x2xf32>
    %9 = tpu.matmul %8, %3, %cst {dimension_numbers = #tpu.dot_dimension_numbers<[1], [0], [0], [1], [0, 0, 1, 1], [], []>} : vector<16x1024xbf16>, vector<1024x2xbf16>, vector<16x2xf32> -> vector<16x2xf32>
    %10 = vector.broadcast %6 : f32 to vector<16x2xf32>
    %11 = arith.mulf %10, %9 : vector<16x2xf32>
    %12 = arith.addf %5, %11 : vector<16x2xf32>
    %c1 = arith.constant 1 : index
    %13 = memref.load %arg2[%c1] : memref<3xf32, #tpu.memory_space<smem>>
    %c1_9 = arith.constant 1 : index
    %c0_10 = arith.constant 0 : index
    %c0_11 = arith.constant 0 : index
    %14 = vector.load %arg4[%c1_9, %c0_10, %c0_11] : memref<3x16x1024xbf16, #tpu.memory_space<vmem>>, vector<1x16x1024xbf16>
    %15 = vector.shape_cast %14 : vector<1x16x1024xbf16> to vector<16x1024xbf16>
    %cst_12 = arith.constant dense<0.000000e+00> : vector<16x2xf32>
    %16 = tpu.matmul %15, %3, %cst_12 {dimension_numbers = #tpu.dot_dimension_numbers<[1], [0], [0], [1], [0, 0, 1, 1], [], []>} : vector<16x1024xbf16>, vector<1024x2xbf16>, vector<16x2xf32> -> vector<16x2xf32>
    %17 = vector.broadcast %13 : f32 to vector<16x2xf32>
    %18 = arith.mulf %17, %16 : vector<16x2xf32>
    %19 = arith.addf %12, %18 : vector<16x2xf32>
    %c2 = arith.constant 2 : index
    %20 = memref.load %arg2[%c2] : memref<3xf32, #tpu.memory_space<smem>>
    %c2_13 = arith.constant 2 : index
    %c0_14 = arith.constant 0 : index
    %c0_15 = arith.constant 0 : index
    %21 = vector.load %arg4[%c2_13, %c0_14, %c0_15] : memref<3x16x1024xbf16, #tpu.memory_space<vmem>>, vector<1x16x1024xbf16>
    %22 = vector.shape_cast %21 : vector<1x16x1024xbf16> to vector<16x1024xbf16>
    %cst_16 = arith.constant dense<0.000000e+00> : vector<16x2xf32>
    %23 = tpu.matmul %22, %3, %cst_16 {dimension_numbers = #tpu.dot_dimension_numbers<[1], [0], [0], [1], [0, 0, 1, 1], [], []>} : vector<16x1024xbf16>, vector<1024x2xbf16>, vector<16x2xf32> -> vector<16x2xf32>
    %24 = vector.broadcast %20 : f32 to vector<16x2xf32>
    %25 = arith.mulf %24, %23 : vector<16x2xf32>
    %26 = arith.addf %19, %25 : vector<16x2xf32>
    %c0_17 = arith.constant 0 : index
    %c0_18 = arith.constant 0 : index
    %c0_19 = arith.constant 0 : index
    %27 = vector.load %arg6[%c0_17, %c0_18, %c0_19] : memref<1x16x2xf32, #tpu.memory_space<vmem>>, vector<1x16x2xf32>
    %28 = vector.shape_cast %27 : vector<1x16x2xf32> to vector<16x2xf32>
    %29 = vector.shape_cast %26 : vector<16x2xf32> to vector<1x16x2xf32>
    tpu.vector_store %arg6[%c0_17, %c0_18, %c0_19], %29 {strides = array<i32>} : memref<1x16x2xf32, #tpu.memory_space<vmem>>, vector<1x16x2xf32>,
    return
  }
  func.func @transform_0(%arg0: i32, %arg1: i32, %arg2: memref<3xf32, #tpu.memory_space<smem>>) -> (i32, i32) {
    %c1_i32 = arith.constant 1 : i32
    %0 = arith.muli %arg0, %c1_i32 : i32
    %1 = arith.addi %0, %arg1 : i32
    %c0_i32 = arith.constant 0 : i32
    %c0_i32_0 = arith.constant 0 : i32
    return %1, %c0_i32 : i32, i32
  }
  func.func @transform_1(%arg0: i32, %arg1: i32, %arg2: memref<3xf32, #tpu.memory_space<smem>>) -> (i32, i32, i32) {
    %c1_i32 = arith.constant 1 : i32
    %0 = arith.muli %arg0, %c1_i32 : i32
    %1 = arith.addi %0, %arg1 : i32
    %c0_i32 = arith.constant 0 : i32
    %c0_i32_0 = arith.constant 0 : i32
    %c0_i32_1 = arith.constant 0 : i32
    return %c0_i32, %c0_i32_0, %1 : i32, i32, i32
  }
  func.func @transform_2(%arg0: i32, %arg1: i32, %arg2: memref<3xf32, #tpu.memory_space<smem>>) -> (i32, i32) {
    %c0_i32 = arith.constant 0 : i32
    %c0_i32_0 = arith.constant 0 : i32
    %c0_i32_1 = arith.constant 0 : i32
    return %c0_i32, %c0_i32_0 : i32, i32
  }
  func.func @transform_3(%arg0: i32, %arg1: i32, %arg2: memref<3xf32, #tpu.memory_space<smem>>) -> (i32, i32, i32) {
    %c0_i32 = arith.constant 0 : i32
    %c0_i32_0 = arith.constant 0 : i32
    %c0_i32_1 = arith.constant 0 : i32
    return %arg0, %c0_i32, %c0_i32_0 : i32, i32, i32
  }
}

</mosaic_0001>

<bundles_post_ra>
// kernel: tpu_custom_call.1
= control target key start
LH: loop header
LB: loop body
LE: loop exit
PB: predicated region body
PF: predicated region fallthrough
CT: control target
= control target key end

     0   :  { %s1600_s18 = smov [#allocation3]   ;;  %s2329_s0 = inlined_call_operand.vmem [shape: f32[3], index: 0, kind: input, shape index: {}]   ;;  %s2330_s1 = inlined_call_operand.vmem [shape: bf16[1024,2], index: 1, kind: input, shape index: {}]   ;;  %s2331_s2 = inlined_call_operand.vmem [shape: bf16[3,16,1024], index: 2, kind: input, shape index: {}]   ;;  %s2332_s3 = inlined_call_operand.vmem [shape: f32[16,1], index: 3, kind: input, shape index: {}]   ;;  %s2333_s4 = inlined_call_operand.vmem [shape: f32[1,16,2], index: 4, kind: output, shape index: {}]  }
   0x1   :  { %s10_s17 = sshll.u32 %s2329_s0, 4  ;;  %s11_s17 = int_to_ptr.vmem [resolvable:$true] %s10_s17 }
   0x2   :  { %13 = dma.vmem_to_smem %s11_s17, 16, %s1600_s18, [#allocation2] }
   0x3   :  { %1598 = dma.done.wait [#allocation2], 16 }
   0x4   :  { %1599 = vsyncadd [#allocation2], 4294967280 }
   0x5   :  { %16 = sfence }
   0x6   :  { %v1633_v0 = vld [vmem:[%s2330_s1 + $0x38] sm:$0xff]  ;;  %v1655_v4 = vld [vmem:[%s2330_s1 + $0x30] sm:$0xff]  ;;  %v1679_v8 = vld [vmem:[%s2330_s1 + $0x28] sm:$0xff]  ;;  %vm89_vm0 = vcmask 15360   ;;  %s2307_s28 = sld [smem:[#allocation3 + $0x1]] }
   0x7   :  { %v1638_v1 = vld [vmem:[%s2330_s1 + $0x78] sm:$0xff]  ;;  %655 = vmatpush.bf16.msra.mxu0 %v1633_v0  ;;  %v1660_v5 = vld [vmem:[%s2330_s1 + $0x70] sm:$0xff]  ;;  %v1684_v9 = vld [vmem:[%s2330_s1 + $0x68] sm:$0xff]  ;;  %s2309_s29 = sld [smem:[#allocation3 + $0x2]] }
   0x8   :  { %v1643_v2 = vld [vmem:[%s2330_s1 + $0xb8] sm:$0xff]  ;;  %669 = vmatpush.bf16.msra.mxu1 %v1638_v1  ;;  %v1667_v6 = vld [vmem:[%s2330_s1 + $0xb0] sm:$0xff]  ;;  %v1691_v10 = vld [vmem:[%s2330_s1 + $0xa8] sm:$0xff] }
   0x9   :  { %v1648_v3 = vld [vmem:[%s2330_s1 + $0xf8] sm:$0xff]  ;;  %683 = vmatpush.bf16.msra.mxu2 %v1643_v2  ;;  %v1672_v7 = vld [vmem:[%s2330_s1 + $0xf0] sm:$0xff]  ;;  %v1696_v11 = vld [vmem:[%s2330_s1 + $0xe8] sm:$0xff] }
   0xa   :  { %697 = vmatpush.bf16.msra.mxu3 %v1648_v3  ;;  %v1703_v12 = vld [vmem:[%s2330_s1 + $0x20] sm:$0xff]  ;;  %v1727_v16 = vld [vmem:[%s2330_s1 + $0x18] sm:$0xff]  ;;  %v1751_v20 = vld [vmem:[%s2330_s1 + $0x10] sm:$0xff] }
   0xb   :  { %656 = vmatpush.bf16.msra.mxu0 %v1655_v4  ;;  %v1708_v13 = vld [vmem:[%s2330_s1 + $0x60] sm:$0xff]  ;;  %v1732_v17 = vld [vmem:[%s2330_s1 + $0x58] sm:$0xff]  ;;  %v1756_v21 = vld [vmem:[%s2330_s1 + $0x50] sm:$0xff] }
   0xc   :  { %670 = vmatpush.bf16.msra.mxu1 %v1660_v5  ;;  %v1715_v14 = vld [vmem:[%s2330_s1 + $0xa0] sm:$0xff]  ;;  %v1739_v18 = vld [vmem:[%s2330_s1 + $0x98] sm:$0xff]  ;;  %v1763_v22 = vld [vmem:[%s2330_s1 + $0x90] sm:$0xff] }
   0xd   :  { %684 = vmatpush.bf16.msra.mxu2 %v1667_v6  ;;  %v1720_v15 = vld [vmem:[%s2330_s1 + $0xe0] sm:$0xff]  ;;  %v1744_v19 = vld [vmem:[%s2330_s1 + $0xd8] sm:$0xff]  ;;  %v1768_v23 = vld [vmem:[%s2330_s1 + $0xd0] sm:$0xff] }
   0xe   :  { %698 = vmatpush.bf16.msra.mxu3 %v1672_v7  ;;  %v1775_v24 = vld [vmem:[%s2330_s1 + $0x8] sm:$0xff]  ;;  %v1797_v28 = vld [vmem:[%s2330_s1] sm:$0xff]  ;;  %v1819_v32 = vld [vmem:[%s2330_s1 + $0x138] sm:$0xff] }
   0xf   :  { %657 = vmatpush.bf16.msra.mxu0 %v1679_v8  ;;  %v1780_v25 = vld [vmem:[%s2330_s1 + $0x48] sm:$0xff]  ;;  %v1802_v29 = vld [vmem:[%s2330_s1 + $0x40] sm:$0xff]  ;;  %v1824_v33 = vld [vmem:[%s2330_s1 + $0x178] sm:$0xff] }
  0x10   :  { %671 = vmatpush.bf16.msra.mxu1 %v1684_v9  ;;  %v1787_v26 = vld [vmem:[%s2330_s1 + $0x88] sm:$0xff]  ;;  %v1807_v30 = vld [vmem:[%s2330_s1 + $0x80] sm:$0xff]  ;;  %v1855_v42 = vld [vmem:[%s2330_s1 + $0x1b8] sm:$0xff] }
  0x11   :  { %685 = vmatpush.bf16.msra.mxu2 %v1691_v10  ;;  %v1792_v27 = vld [vmem:[%s2330_s1 + $0xc8] sm:$0xff]  ;;  %v1812_v31 = vld [vmem:[%s2330_s1 + $0xc0] sm:$0xff]  ;;  %v1860_v43 = vld [vmem:[%s2330_s1 + $0x1f8] sm:$0xff] }
  0x12   :  { %699 = vmatpush.bf16.msra.mxu3 %v1696_v11  ;;  %v1127_v34 = vld [vmem:[%s2331_s2] sm:$0xf]  ;;  %v1135_v36 = vld [vmem:[%s2331_s2 + $0x8] sm:$0xf]  ;;  %v1559_v38 = vld [vmem:[%s2331_s2 + $0x4] sm:$0xf] }
  0x13   :  { %658 = vmatpush.bf16.msra.mxu0 %v1703_v12  ;;  %v1563_v35 = vld [vmem:[%s2331_s2 + $0x1c] sm:$0xf0]  ;;  %v1564_v37 = vld [vmem:[%s2331_s2 + $0x24] sm:$0xf0]  ;;  %v1129_v39 = vld [vmem:[%s2331_s2 + $0x20] sm:$0xf0] }
  0x14   :  { %672 = vmatpush.bf16.msra.mxu1 %v1708_v13  ;;  %v1560_v40 = vld [vmem:[%s2331_s2 + $0xc] sm:$0xf]  ;;  %v1128_v44 = vor.u32 %v1563_v35, %v1127_v34  ;;  %v1136_v45 = vor.u32 %v1564_v37, %v1135_v36  ;;  %v1132_v46 = vor.u32 %v1559_v38, %v1129_v39  ;;  %v1871_v48 = vld [vmem:[%s2330_s1 + $0x130] sm:$0xff]  ;;  %v1919_v56 = vld [vmem:[%s2330_s1 + $0x120] sm:$0xff]  ;;  %v1601_v34 = vmov 0  }
  0x15   :  { %686 = vmatpush.bf16.msra.mxu2 %v1715_v14  ;;  %v1137_v41 = vld [vmem:[%s2331_s2 + $0x28] sm:$0xf0]  ;;  %v1876_v49 = vld [vmem:[%s2330_s1 + $0x170] sm:$0xff]  ;;  %v1924_v57 = vld [vmem:[%s2330_s1 + $0x160] sm:$0xff]  ;;  %1585 = vset.pattern.permute.xlu0 %v1601_v34 }
  0x16   :  { %700 = vmatpush.bf16.msra.mxu3 %v1720_v15  ;;  %v1140_v47 = vor.u32 %v1560_v40, %v1137_v41  ;;  %v1883_v50 = vld [vmem:[%s2330_s1 + $0x1b0] sm:$0xff]  ;;  %v1895_v52 = vld [vmem:[%s2330_s1 + $0x128] sm:$0xff]  ;;  %v1931_v58 = vld [vmem:[%s2330_s1 + $0x1a0] sm:$0xff] }
  0x17   :  { %659 = vmatpush.bf16.msra.mxu0 %v1727_v16  ;;  %v1888_v51 = vld [vmem:[%s2330_s1 + $0x1f0] sm:$0xff]  ;;  %v1900_v53 = vld [vmem:[%s2330_s1 + $0x168] sm:$0xff]  ;;  %v1936_v59 = vld [vmem:[%s2330_s1 + $0x1e0] sm:$0xff] }
  0x18   :  { %673 = vmatpush.bf16.msra.mxu1 %v1732_v17  ;;  %v1907_v54 = vld [vmem:[%s2330_s1 + $0x1a8] sm:$0xff]  ;;  %2360 = vst [vmem:[#allocation5_spill] sm:$0xff] %v1936_v59  ;;  %v1943_v60 = vld [vmem:[%s2330_s1 + $0x118] sm:$0xff]  ;;  %v72_v35 = vld [vmem:[%s2332_s3] sm:$0xff] }
  0x19   :  { %687 = vmatpush.bf16.msra.mxu2 %v1739_v18  ;;  %v1912_v55 = vld [vmem:[%s2330_s1 + $0x1e8] sm:$0xff]  ;;  %2361 = vst [vmem:[#allocation6_spill] sm:$0xff] %v1943_v60  ;;  %v1948_v61 = vld [vmem:[%s2330_s1 + $0x158] sm:$0xff]  ;;  %v1970_v36 = vld [vmem:[%s2330_s1 + $0x110] sm:$0xff]  ;;  %76 = vperm.xlu0 %1585, %v72_v35  }
  0x1a   :  { %701 = vmatpush.bf16.msra.mxu3 %v1744_v19  ;;  %2362 = vst [vmem:[#allocation7_spill] sm:$0xff] %v1948_v61  ;;  %v1955_v62 = vld [vmem:[%s2330_s1 + $0x198] sm:$0xff]  ;;  %v1975_v37 = vld [vmem:[%s2330_s1 + $0x150] sm:$0xff]  ;;  %v1994_v40 = vld [vmem:[%s2330_s1 + $0x108] sm:$0xff] }
  0x1b   :  { %660 = vmatpush.bf16.msra.mxu0 %v1751_v20  ;;  %2363 = vst [vmem:[#allocation8_spill] sm:$0xff] %v1955_v62  ;;  %v1960_v63 = vld [vmem:[%s2330_s1 + $0x1d8] sm:$0xff]  ;;  %v1982_v38 = vld [vmem:[%s2330_s1 + $0x190] sm:$0xff]  ;;  %v1999_v41 = vld [vmem:[%s2330_s1 + $0x148] sm:$0xff] }
  0x1c   :  { %674 = vmatpush.bf16.msra.mxu1 %v1756_v21  ;;  %2364 = vst [vmem:[#allocation9_spill] sm:$0xff] %v1960_v63  ;;  %v1987_v39 = vld [vmem:[%s2330_s1 + $0x1d0] sm:$0xff]  ;;  %v2026_v34 = vld [vmem:[%s2330_s1 + $0x180] sm:$0xff]  ;;  %v73_v35 = vld [vmem:[%s2332_s3 + $0x8] sm:$0xff] }
  0x1d   :  { %688 = vmatpush.bf16.msra.mxu2 %v1763_v22  ;;  %2365 = vst [vmem:[#allocation10_spill] sm:$0xff] %v1970_v36 }
  0x1e   :  { %702 = vmatpush.bf16.msra.mxu3 %v1768_v23  ;;  %2366 = vst [vmem:[#allocation11_spill] sm:$0xff] %v1975_v37 }
  0x1f   :  { %661 = vmatpush.bf16.msra.mxu0 %v1775_v24  ;;  %2367 = vst [vmem:[#allocation12_spill] sm:$0xff] %v1982_v38 }
  0x20   :  { %675 = vmatpush.bf16.msra.mxu1 %v1780_v25  ;;  %2368 = vst [vmem:[#allocation13_spill] sm:$0xff] %v1987_v39 }
  0x21   :  { %689 = vmatpush.bf16.msra.mxu2 %v1787_v26  ;;  %2369 = vst [vmem:[#allocation14_spill] sm:$0xff] %v1994_v40  ;;  %81 = vperm.xlu0 %1585, %v73_v35   ;;  %v2373_v35 = vld [vmem:[#allocation5_spill] sm:$0xff] }
  0x22   :  { %703 = vmatpush.bf16.msra.mxu3 %v1792_v27  ;;  %2370 = vst [vmem:[#allocation15_spill] sm:$0xff] %v1999_v41 }
  0x23   :  { %662 = vmatpush.bf16.msra.mxu0 %v1797_v28 }
  0x24   :  { %676 = vmatpush.bf16.msra.mxu1 %v1802_v29 }
  0x25   :  { %690 = vmatpush.bf16.msra.mxu2 %v1807_v30 }
  0x26   :  { %704 = vmatpush.bf16.msra.mxu3 %v1812_v31  ;;  %663 = vmatmul.bf16.vlgmr.msra.gmra.mxu0 %v1128_v44  ;;  %v2006_v44 = vld [vmem:[%s2330_s1 + $0x188] sm:$0xff] }
  0x27   :  { %711 = vmatpush.bf16.msrb.mxu0 %v1819_v32  ;;  %677 = vmatmul.bf16.vlgmr.msra.gmra.mxu1 %v1132_v46  ;;  %2371 = vst [vmem:[#allocation16_spill] sm:$0xff] %v2006_v44  ;;  %v2016_v46 = vld [vmem:[%s2330_s1 + $0x100] sm:$0xff] }
  0x28   :  { %725 = vmatpush.bf16.msrb.mxu1 %v1824_v33  ;;  %691 = vmatmul.bf16.vlgmr.msra.gmra.mxu2 %v1136_v45  ;;  %v2011_v45 = vld [vmem:[%s2330_s1 + $0x1c8] sm:$0xff] }
  0x29   :  { %739 = vmatpush.bf16.msrb.mxu2 %v1855_v42  ;;  %705 = vmatmul.bf16.vlgmr.msra.gmra.mxu3 %v1140_v47  ;;  %2372 = vst [vmem:[#allocation17_spill] sm:$0xff] %v2011_v45  ;;  %v2021_v47 = vld [vmem:[%s2330_s1 + $0x140] sm:$0xff] }
  0x2a   :  { %753 = vmatpush.bf16.msrb.mxu3 %v1860_v43 }
  0x2b   :  { %712 = vmatpush.bf16.msrb.mxu0 %v1871_v48 }
  0x2c   :  { %726 = vmatpush.bf16.msrb.mxu1 %v1876_v49 }
  0x2d   :  { %740 = vmatpush.bf16.msrb.mxu2 %v1883_v50 }
  0x2e   :  { %754 = vmatpush.bf16.msrb.mxu3 %v1888_v51 }
  0x2f   :  { %713 = vmatpush.bf16.msrb.mxu0 %v1895_v52 }
  0x30   :  { %727 = vmatpush.bf16.msrb.mxu1 %v1900_v53 }
  0x31   :  { %741 = vmatpush.bf16.msrb.mxu2 %v1907_v54 }
  0x32   :  { %755 = vmatpush.bf16.msrb.mxu3 %v1912_v55 }
  0x33   :  { %714 = vmatpush.bf16.msrb.mxu0 %v1919_v56 }
  0x34   :  { %728 = vmatpush.bf16.msrb.mxu1 %v1924_v57 }
  0x35   :  { %742 = vmatpush.bf16.msrb.mxu2 %v1931_v58 }
  0x36   :  { %756 = vmatpush.bf16.msrb.mxu3 %v1936_v59 }
  0x37   :  { %715 = vmatpush.bf16.msrb.mxu0 %v1943_v60 }
  0x38   :  { %729 = vmatpush.bf16.msrb.mxu1 %v1948_v61 }
  0x39   :  { %743 = vmatpush.bf16.msrb.mxu2 %v1955_v62 }
  0x3a   :  { %757 = vmatpush.bf16.msrb.mxu3 %v1960_v63  ;;  %v1145_v63 = vld [vmem:[%s2331_s2 + $0x30] sm:$0xf0] }
  0x3b   :  { %716 = vmatpush.bf16.msrb.mxu0 %v1970_v36  ;;  %v1561_v36 = vld [vmem:[%s2331_s2 + $0x14] sm:$0xf] }
  0x3c   :  { %730 = vmatpush.bf16.msrb.mxu1 %v1975_v37  ;;  %v1565_v37 = vld [vmem:[%s2331_s2 + $0x2c] sm:$0xf0]  ;;  %v1148_v60 = vor.u32 %v1561_v36, %v1145_v63  ;;  %v1567_v63 = vld [vmem:[%s2331_s2 + $0x44] sm:$0xf] }
  0x3d   :  { %744 = vmatpush.bf16.msrb.mxu2 %v1982_v38  ;;  %v1143_v38 = vld [vmem:[%s2331_s2 + $0x10] sm:$0xf]  ;;  %v1426_v36 = vld [vmem:[%s2331_s2 + $0x60] sm:$0xf0] }
  0x3e   :  { %758 = vmatpush.bf16.msrb.mxu3 %v1987_v39  ;;  %v2036_v39 = vld [vmem:[%s2330_s1 + $0x1c0] sm:$0xff]  ;;  %v1144_v62 = vor.u32 %v1565_v37, %v1143_v38  ;;  %v1568_v37 = vld [vmem:[%s2331_s2 + $0x4c] sm:$0xf] }
  0x3f   :  { %717 = vmatpush.bf16.msrb.mxu0 %v1994_v40  ;;  %v1566_v40 = vld [vmem:[%s2331_s2 + $0x34] sm:$0xf0]  ;;  %v1434_v38 = vld [vmem:[%s2331_s2 + $0x68] sm:$0xf0] }
  0x40   :  { %731 = vmatpush.bf16.msrb.mxu1 %v1999_v41  ;;  %v1151_v41 = vld [vmem:[%s2331_s2 + $0x18] sm:$0xf] }
  0x41   :  { %745 = vmatpush.bf16.msrb.mxu2 %v2006_v44  ;;  %v1153_v44 = vld [vmem:[%s2331_s2 + $0x38] sm:$0xf0]  ;;  %v1152_v61 = vor.u32 %v1566_v40, %v1151_v41 }
  0x42   :  { %759 = vmatpush.bf16.msrb.mxu3 %v2011_v45  ;;  %v1562_v45 = vld [vmem:[%s2331_s2 + $0x1c] sm:$0xf] }
  0x43   :  { %718 = vmatpush.bf16.msrb.mxu0 %v2016_v46  ;;  %v1156_v59 = vor.u32 %v1562_v45, %v1153_v44  ;;  %v1429_v44 = vor.u32 %v1567_v63, %v1426_v36  ;;  %v1437_v45 = vor.u32 %v1568_v37, %v1434_v38  ;;  %v2378_v63 = vld [vmem:[#allocation10_spill] sm:$0xff]  ;;  %v2379_v36 = vld [vmem:[#allocation11_spill] sm:$0xff]  ;;  %v2380_v37 = vld [vmem:[#allocation12_spill] sm:$0xff] }
  0x44   :  { %732 = vmatpush.bf16.msrb.mxu1 %v2021_v47  ;;  %v2381_v38 = vld [vmem:[#allocation13_spill] sm:$0xff] }
  0x45   :  { %746 = vmatpush.bf16.msrb.mxu2 %v2026_v34 }
  0x46   :  { %760 = vmatpush.bf16.msrb.mxu3 %v2036_v39  ;;  %719 = vmatmul.bf16.vlgmr.msrb.gmra.mxu0 %v1144_v62  ;;  %v1572_v62 = vld [vmem:[%s2331_s2 + $0x64] sm:$0xf0] }
  0x47   :  { %822 = vmatpush.bf16.msra.mxu0 %v1633_v0  ;;  %733 = vmatmul.bf16.vlgmr.msrb.gmra.mxu1 %v1148_v60  ;;  %v1571_v60 = vld [vmem:[%s2331_s2 + $0x5c] sm:$0xf0] }
  0x48   :  { %836 = vmatpush.bf16.msra.mxu1 %v1638_v1  ;;  %747 = vmatmul.bf16.vlgmr.msrb.gmra.mxu2 %v1152_v61  ;;  %v1432_v61 = vld [vmem:[%s2331_s2 + $0x48] sm:$0xf] }
  0x49   :  { %850 = vmatpush.bf16.msra.mxu2 %v1643_v2  ;;  %761 = vmatmul.bf16.vlgmr.msrb.gmra.mxu3 %v1156_v59  ;;  %v1424_v59 = vld [vmem:[%s2331_s2 + $0x40] sm:$0xf]  ;;  %v1433_v41 = vor.u32 %v1572_v62, %v1432_v61  ;;  %v2376_v61 = vld [vmem:[#allocation8_spill] sm:$0xff] }
  0x4a   :  { %864 = vmatpush.bf16.msra.mxu3 %v1648_v3  ;;  %v1425_v40 = vor.u32 %v1571_v60, %v1424_v59  ;;  %v2374_v59 = vld [vmem:[#allocation6_spill] sm:$0xff]  ;;  %v2375_v60 = vld [vmem:[#allocation7_spill] sm:$0xff]  ;;  %v2377_v62 = vld [vmem:[#allocation9_spill] sm:$0xff] }
  0x4b   :  { %823 = vmatpush.bf16.msra.mxu0 %v1655_v4 }
  0x4c   :  { %837 = vmatpush.bf16.msra.mxu1 %v1660_v5 }
  0x4d   :  { %851 = vmatpush.bf16.msra.mxu2 %v1667_v6 }
  0x4e   :  { %865 = vmatpush.bf16.msra.mxu3 %v1672_v7 }
  0x4f   :  { %824 = vmatpush.bf16.msra.mxu0 %v1679_v8 }
  0x50   :  { %838 = vmatpush.bf16.msra.mxu1 %v1684_v9 }
  0x51   :  { %852 = vmatpush.bf16.msra.mxu2 %v1691_v10 }
  0x52   :  { %866 = vmatpush.bf16.msra.mxu3 %v1696_v11 }
  0x53   :  { %825 = vmatpush.bf16.msra.mxu0 %v1703_v12 }
  0x54   :  { %839 = vmatpush.bf16.msra.mxu1 %v1708_v13 }
  0x55   :  { %853 = vmatpush.bf16.msra.mxu2 %v1715_v14 }
  0x56   :  { %867 = vmatpush.bf16.msra.mxu3 %v1720_v15 }
  0x57   :  { %826 = vmatpush.bf16.msra.mxu0 %v1727_v16 }
  0x58   :  { %840 = vmatpush.bf16.msra.mxu1 %v1732_v17 }
  0x59   :  { %854 = vmatpush.bf16.msra.mxu2 %v1739_v18 }
  0x5a   :  { %868 = vmatpush.bf16.msra.mxu3 %v1744_v19 }
  0x5b   :  { %827 = vmatpush.bf16.msra.mxu0 %v1751_v20 }
  0x5c   :  { %841 = vmatpush.bf16.msra.mxu1 %v1756_v21 }
  0x5d   :  { %855 = vmatpush.bf16.msra.mxu2 %v1763_v22 }
  0x5e   :  { %869 = vmatpush.bf16.msra.mxu3 %v1768_v23 }
  0x5f   :  { %828 = vmatpush.bf16.msra.mxu0 %v1775_v24 }
  0x60   :  { %842 = vmatpush.bf16.msra.mxu1 %v1780_v25 }
  0x61   :  { %856 = vmatpush.bf16.msra.mxu2 %v1787_v26 }
  0x62   :  { %870 = vmatpush.bf16.msra.mxu3 %v1792_v27 }
  0x63   :  { %829 = vmatpush.bf16.msra.mxu0 %v1797_v28 }
  0x64   :  { %843 = vmatpush.bf16.msra.mxu1 %v1802_v29 }
  0x65   :  { %857 = vmatpush.bf16.msra.mxu2 %v1807_v30 }
  0x66   :  { %871 = vmatpush.bf16.msra.mxu3 %v1812_v31  ;;  %830 = vmatmul.bf16.vlgmr.msra.gmra.mxu0 %v1425_v40  ;;  %v2382_v40 = vld [vmem:[#allocation14_spill] sm:$0xff] }
  0x67   :  { %878 = vmatpush.bf16.msrb.mxu0 %v1819_v32  ;;  %844 = vmatmul.bf16.vlgmr.msra.gmra.mxu1 %v1429_v44  ;;  %v1440_v44 = vld [vmem:[%s2331_s2 + $0x50] sm:$0xf] }
  0x68   :  { %892 = vmatpush.bf16.msrb.mxu1 %v1824_v33  ;;  %858 = vmatmul.bf16.vlgmr.msra.gmra.mxu2 %v1433_v41  ;;  %v2383_v41 = vld [vmem:[#allocation15_spill] sm:$0xff] }
  0x69   :  { %906 = vmatpush.bf16.msrb.mxu2 %v1855_v42  ;;  %872 = vmatmul.bf16.vlgmr.msra.gmra.mxu3 %v1437_v45  ;;  %v1573_v45 = vld [vmem:[%s2331_s2 + $0x6c] sm:$0xf0] }
  0x6a   :  { %920 = vmatpush.bf16.msrb.mxu3 %v1860_v43 }
  0x6b   :  { %879 = vmatpush.bf16.msrb.mxu0 %v1871_v48 }
  0x6c   :  { %893 = vmatpush.bf16.msrb.mxu1 %v1876_v49 }
  0x6d   :  { %907 = vmatpush.bf16.msrb.mxu2 %v1883_v50 }
  0x6e   :  { %921 = vmatpush.bf16.msrb.mxu3 %v1888_v51 }
  0x6f   :  { %880 = vmatpush.bf16.msrb.mxu0 %v1895_v52 }
  0x70   :  { %894 = vmatpush.bf16.msrb.mxu1 %v1900_v53 }
  0x71   :  { %908 = vmatpush.bf16.msrb.mxu2 %v1907_v54 }
  0x72   :  { %922 = vmatpush.bf16.msrb.mxu3 %v1912_v55 }
  0x73   :  { %881 = vmatpush.bf16.msrb.mxu0 %v1919_v56 }
  0x74   :  { %895 = vmatpush.bf16.msrb.mxu1 %v1924_v57 }
  0x75   :  { %909 = vmatpush.bf16.msrb.mxu2 %v1931_v58 }
  0x76   :  { %923 = vmatpush.bf16.msrb.mxu3 %v2373_v35 }
  0x77   :  { %882 = vmatpush.bf16.msrb.mxu0 %v2374_v59 }
  0x78   :  { %896 = vmatpush.bf16.msrb.mxu1 %v2375_v60 }
  0x79   :  { %910 = vmatpush.bf16.msrb.mxu2 %v2376_v61 }
  0x7a   :  { %924 = vmatpush.bf16.msrb.mxu3 %v2377_v62  ;;  %v2384_v62 = vld [vmem:[#allocation16_spill] sm:$0xff] }
  0x7b   :  { %883 = vmatpush.bf16.msrb.mxu0 %v2378_v63  ;;  %v2385_v63 = vld [vmem:[#allocation17_spill] sm:$0xff] }
  0x7c   :  { %897 = vmatpush.bf16.msrb.mxu1 %v2379_v36  ;;  %v1441_v36 = vor.u32 %v1573_v45, %v1440_v44 }
  0x7d   :  { %911 = vmatpush.bf16.msrb.mxu2 %v2380_v37  ;;  %v1442_v37 = vld [vmem:[%s2331_s2 + $0x70] sm:$0xf0] }
  0x7e   :  { %925 = vmatpush.bf16.msrb.mxu3 %v2381_v38  ;;  %v1448_v38 = vld [vmem:[%s2331_s2 + $0x58] sm:$0xf] }
  0x7f   :  { %884 = vmatpush.bf16.msrb.mxu0 %v2382_v40  ;;  %v1569_v40 = vld [vmem:[%s2331_s2 + $0x54] sm:$0xf] }
  0x80   :  { %898 = vmatpush.bf16.msrb.mxu1 %v2383_v41  ;;  %v1574_v41 = vld [vmem:[%s2331_s2 + $0x74] sm:$0xf0]  ;;  %v1445_v60 = vor.u32 %v1569_v40, %v1442_v37 }
  0x81   :  { %912 = vmatpush.bf16.msrb.mxu2 %v2384_v62  ;;  %v1450_v62 = vld [vmem:[%s2331_s2 + $0x78] sm:$0xf0]  ;;  %v1449_v61 = vor.u32 %v1574_v41, %v1448_v38 }
  0x82   :  { %926 = vmatpush.bf16.msrb.mxu3 %v2385_v63  ;;  %v1570_v63 = vld [vmem:[%s2331_s2 + $0x5c] sm:$0xf] }
  0x83   :  { %885 = vmatpush.bf16.msrb.mxu0 %v2016_v46  ;;  %v1453_v59 = vor.u32 %v1570_v63, %v1450_v62 }
  0x84   :  { %899 = vmatpush.bf16.msrb.mxu1 %v2021_v47 }
  0x85   :  { %913 = vmatpush.bf16.msrb.mxu2 %v2026_v34 }
  0x86   :  { %927 = vmatpush.bf16.msrb.mxu3 %v2036_v39  ;;  %886 = vmatmul.bf16.vlgmr.msrb.gmra.mxu0 %v1441_v36 }
  0x87   :  { %989 = vmatpush.bf16.msra.mxu0 %v1633_v0  ;;  %900 = vmatmul.bf16.vlgmr.msrb.gmra.mxu1 %v1445_v60  ;;  %v1473_v0 = vld [vmem:[%s2331_s2 + $0x88] sm:$0xf] }
  0x88   :  { %1003 = vmatpush.bf16.msra.mxu1 %v1638_v1  ;;  %914 = vmatmul.bf16.vlgmr.msrb.gmra.mxu2 %v1449_v61  ;;  %v1580_v1 = vld [vmem:[%s2331_s2 + $0xa4] sm:$0xf0] }
  0x89   :  { %1017 = vmatpush.bf16.msra.mxu2 %v1643_v2  ;;  %928 = vmatmul.bf16.vlgmr.msrb.gmra.mxu3 %v1453_v59  ;;  %v1576_v2 = vld [vmem:[%s2331_s2 + $0x8c] sm:$0xf] }
  0x8a   :  { %1031 = vmatpush.bf16.msra.mxu3 %v1648_v3  ;;  %v1475_v3 = vld [vmem:[%s2331_s2 + $0xa8] sm:$0xf0] }
  0x8b   :  { %990 = vmatpush.bf16.msra.mxu0 %v1655_v4  ;;  %v1465_v4 = vld [vmem:[%s2331_s2 + $0x80] sm:$0xf] }
  0x8c   :  { %1004 = vmatpush.bf16.msra.mxu1 %v1660_v5  ;;  %v1579_v5 = vld [vmem:[%s2331_s2 + $0x9c] sm:$0xf0] }
  0x8d   :  { %1018 = vmatpush.bf16.msra.mxu2 %v1667_v6  ;;  %v1575_v6 = vld [vmem:[%s2331_s2 + $0x84] sm:$0xf] }
  0x8e   :  { %1032 = vmatpush.bf16.msra.mxu3 %v1672_v7  ;;  %v1467_v7 = vld [vmem:[%s2331_s2 + $0xa0] sm:$0xf0] }
  0x8f   :  { %991 = vmatpush.bf16.msra.mxu0 %v1679_v8  ;;  %v1474_v8 = vor.u32 %v1580_v1, %v1473_v0 }
  0x90   :  { %1005 = vmatpush.bf16.msra.mxu1 %v1684_v9  ;;  %v1478_v9 = vor.u32 %v1576_v2, %v1475_v3 }
  0x91   :  { %1019 = vmatpush.bf16.msra.mxu2 %v1691_v10  ;;  %v1466_v10 = vor.u32 %v1579_v5, %v1465_v4 }
  0x92   :  { %1033 = vmatpush.bf16.msra.mxu3 %v1696_v11  ;;  %v1470_v11 = vor.u32 %v1575_v6, %v1467_v7 }
  0x93   :  { %992 = vmatpush.bf16.msra.mxu0 %v1703_v12 }
  0x94   :  { %1006 = vmatpush.bf16.msra.mxu1 %v1708_v13 }
  0x95   :  { %1020 = vmatpush.bf16.msra.mxu2 %v1715_v14 }
  0x96   :  { %1034 = vmatpush.bf16.msra.mxu3 %v1720_v15  ;;  %v77_v15 = vpop.permute.xlu0 %76 }
  0x97   :  { %993 = vmatpush.bf16.msra.mxu0 %v1727_v16  ;;  %90 = vst.msk [vmem:[%s2333_s4] sm:$0xff] %vm89_vm0, %v77_v15 }
  0x98   :  { %1007 = vmatpush.bf16.msra.mxu1 %v1732_v17 }
  0x99   :  { %1021 = vmatpush.bf16.msra.mxu2 %v1739_v18 }
  0x9a   :  { %1035 = vmatpush.bf16.msra.mxu3 %v1744_v19  ;;  %v2386_v19 = vld [vmem:[#allocation6_spill] sm:$0xff] }
  0x9b   :  { %994 = vmatpush.bf16.msra.mxu0 %v1751_v20  ;;  %v2387_v20 = vld [vmem:[#allocation7_spill] sm:$0xff] }
  0x9c   :  { %1008 = vmatpush.bf16.msra.mxu1 %v1756_v21 }
  0x9d   :  { %1022 = vmatpush.bf16.msra.mxu2 %v1763_v22 }
  0x9e   :  { %1036 = vmatpush.bf16.msra.mxu3 %v1768_v23 }
  0x9f   :  { %995 = vmatpush.bf16.msra.mxu0 %v1775_v24  ;;  %v2388_v24 = vld [vmem:[#allocation8_spill] sm:$0xff] }
  0xa0   :  { %1009 = vmatpush.bf16.msra.mxu1 %v1780_v25  ;;  %v2389_v25 = vld [vmem:[#allocation9_spill] sm:$0xff] }
  0xa1   :  { %1023 = vmatpush.bf16.msra.mxu2 %v1787_v26 }
  0xa2   :  { %1037 = vmatpush.bf16.msra.mxu3 %v1792_v27  ;;  %v2390_v27 = vld [vmem:[#allocation10_spill] sm:$0xff] }
  0xa3   :  { %996 = vmatpush.bf16.msra.mxu0 %v1797_v28  ;;  %v664_v12 = vpop.f32.mrf.mxu0  ;;  %v2391_v28 = vld [vmem:[#allocation11_spill] sm:$0xff] }
  0xa4   :  { %1010 = vmatpush.bf16.msra.mxu1 %v1802_v29  ;;  %v678_v13 = vpop.f32.mrf.mxu1  ;;  %v82_v29 = vpop.permute.xlu0 %81 }
  0xa5   :  { %1024 = vmatpush.bf16.msra.mxu2 %v1807_v30  ;;  %v679_v14 = vadd.f32 %v678_v13, %v664_v12  ;;  %v2392_v30 = vld [vmem:[#allocation12_spill] sm:$0xff]  ;;  %91 = vst.msk [vmem:[%s2333_s4 + $0x8] sm:$0xff] %vm89_vm0, %v82_v29 }
  0xa6   :  { %1038 = vmatpush.bf16.msra.mxu3 %v1812_v31  ;;  %997 = vmatmul.bf16.vlgmr.msra.gmra.mxu0 %v1466_v10  ;;  %v2393_v31 = vld [vmem:[#allocation13_spill] sm:$0xff] }
  0xa7   :  { %1045 = vmatpush.bf16.msrb.mxu0 %v1819_v32  ;;  %1011 = vmatmul.bf16.vlgmr.msra.gmra.mxu1 %v1470_v11 }
  0xa8   :  { %1059 = vmatpush.bf16.msrb.mxu1 %v1824_v33  ;;  %1025 = vmatmul.bf16.vlgmr.msra.gmra.mxu2 %v1474_v8 }
  0xa9   :  { %1073 = vmatpush.bf16.msrb.mxu2 %v1855_v42  ;;  %1039 = vmatmul.bf16.vlgmr.msra.gmra.mxu3 %v1478_v9  ;;  %v1481_v42 = vld [vmem:[%s2331_s2 + $0x90] sm:$0xf] }
  0xaa   :  { %1087 = vmatpush.bf16.msrb.mxu3 %v1860_v43  ;;  %v1581_v43 = vld [vmem:[%s2331_s2 + $0xac] sm:$0xf0] }
  0xab   :  { %1046 = vmatpush.bf16.msrb.mxu0 %v1871_v48  ;;  %v692_v16 = vpop.f32.mrf.mxu2  ;;  %v666_v21 = vpop.f32.mrf.mxu0  ;;  %v1482_v59 = vor.u32 %v1581_v43, %v1481_v42 }
  0xac   :  { %1060 = vmatpush.bf16.msrb.mxu1 %v1876_v49  ;;  %v693_v17 = vadd.f32 %v692_v16, %v679_v14  ;;  %v706_v18 = vpop.f32.mrf.mxu3  ;;  %v680_v23 = vpop.f32.mrf.mxu1  ;;  %v2394_v49 = vld [vmem:[#allocation14_spill] sm:$0xff] }
  0xad   :  { %1074 = vmatpush.bf16.msrb.mxu2 %v1883_v50  ;;  %v681_v26 = vadd.f32 %v680_v23, %v666_v21  ;;  %v2395_v50 = vld [vmem:[#allocation15_spill] sm:$0xff] }
  0xae   :  { %1088 = vmatpush.bf16.msrb.mxu3 %v1888_v51  ;;  %v2258_v22 = vadd.f32 %v706_v18, %v693_v17  ;;  %v1577_v51 = vld [vmem:[%s2331_s2 + $0x94] sm:$0xf] }
  0xaf   :  { %1047 = vmatpush.bf16.msrb.mxu0 %v1895_v52  ;;  %v1483_v52 = vld [vmem:[%s2331_s2 + $0xb0] sm:$0xf0] }
  0xb0   :  { %1061 = vmatpush.bf16.msrb.mxu1 %v1900_v53  ;;  %v1489_v53 = vld [vmem:[%s2331_s2 + $0x98] sm:$0xf]  ;;  %v1486_v60 = vor.u32 %v1577_v51, %v1483_v52 }
  0xb1   :  { %1075 = vmatpush.bf16.msrb.mxu2 %v1907_v54 }
  0xb2   :  { %1089 = vmatpush.bf16.msrb.mxu3 %v1912_v55  ;;  %v2396_v55 = vld [vmem:[#allocation16_spill] sm:$0xff] }
  0xb3   :  { %1048 = vmatpush.bf16.msrb.mxu0 %v1919_v56  ;;  %v694_v32 = vpop.f32.mrf.mxu2  ;;  %v2397_v56 = vld [vmem:[#allocation17_spill] sm:$0xff] }
  0xb4   :  { %1062 = vmatpush.bf16.msrb.mxu1 %v1924_v57  ;;  %v695_v33 = vadd.f32 %v694_v32, %v681_v26  ;;  %v708_v48 = vpop.f32.mrf.mxu3  ;;  %v1582_v57 = vld [vmem:[%s2331_s2 + $0xb4] sm:$0xf0] }
  0xb5   :  { %1076 = vmatpush.bf16.msrb.mxu2 %v1931_v58  ;;  %v1578_v58 = vld [vmem:[%s2331_s2 + $0x9c] sm:$0xf]  ;;  %v1490_v61 = vor.u32 %v1582_v57, %v1489_v53 }
  0xb6   :  { %1090 = vmatpush.bf16.msrb.mxu3 %v2373_v35  ;;  %v709_v54 = vadd.f32 %v708_v48, %v695_v33  ;;  %v1491_v35 = vld [vmem:[%s2331_s2 + $0xb8] sm:$0xf0]  ;;  %s2305_s2 = sld [smem:[#allocation3]] }
  0xb7   :  { %1049 = vmatpush.bf16.msrb.mxu0 %v2386_v19  ;;  %v1494_v62 = vor.u32 %v1578_v58, %v1491_v35 }
  0xb8   :  { %1063 = vmatpush.bf16.msrb.mxu1 %v2387_v20 }
  0xb9   :  { %1077 = vmatpush.bf16.msrb.mxu2 %v2388_v24 }
  0xba   :  { %1091 = vmatpush.bf16.msrb.mxu3 %v2389_v25 }
  0xbb   :  { %1050 = vmatpush.bf16.msrb.mxu0 %v2390_v27 }
  0xbc   :  { %1064 = vmatpush.bf16.msrb.mxu1 %v2391_v28  ;;  %v767_v53 = vstv %s2305_s2 }
  0xbd   :  { %1078 = vmatpush.bf16.msrb.mxu2 %v2392_v30 }
  0xbe   :  { %1092 = vmatpush.bf16.msrb.mxu3 %v2393_v31 }
  0xbf   :  { %1051 = vmatpush.bf16.msrb.mxu0 %v2394_v49 }
  0xc0   :  { %1065 = vmatpush.bf16.msrb.mxu1 %v2395_v50 }
  0xc1   :  { %1079 = vmatpush.bf16.msrb.mxu2 %v2396_v55 }
  0xc2   :  { %1093 = vmatpush.bf16.msrb.mxu3 %v2397_v56 }
  0xc3   :  { %1052 = vmatpush.bf16.msrb.mxu0 %v2016_v46  ;;  %v720_v63 = vpop.f32.mrf.mxu0 }
  0xc4   :  { %1066 = vmatpush.bf16.msrb.mxu1 %v2021_v47  ;;  %v734_v36 = vpop.f32.mrf.mxu1  ;;  %v721_v19 = vadd.f32 %v720_v63, %v2258_v22 }
  0xc5   :  { %1080 = vmatpush.bf16.msrb.mxu2 %v2026_v34 }
  0xc6   :  { %1094 = vmatpush.bf16.msrb.mxu3 %v2036_v39  ;;  %1053 = vmatmul.bf16.vlgmr.msrb.gmra.mxu0 %v1482_v59  ;;  %v735_v25 = vadd.f32 %v734_v36, %v721_v19 }
  0xc7   :  { %1067 = vmatmul.bf16.vlgmr.msrb.gmra.mxu1 %v1486_v60 }
  0xc8   :  { %1081 = vmatmul.bf16.vlgmr.msrb.gmra.mxu2 %v1490_v61 }
  0xc9   :  { %1095 = vmatmul.bf16.vlgmr.msrb.gmra.mxu3 %v1494_v62  ;;  %v220_v62 = vld [vmem:[%s2333_s4] sm:$0xff] }
  0xcb   :  { %v748_v37 = vpop.f32.mrf.mxu2  ;;  %v722_v40 = vpop.f32.mrf.mxu0 }
  0xcc   :  { %v762_v38 = vpop.f32.mrf.mxu3  ;;  %v736_v41 = vpop.f32.mrf.mxu1  ;;  %v749_v30 = vadd.f32 %v748_v37, %v735_v25  ;;  %v723_v31 = vadd.f32 %v722_v40, %v709_v54  ;;  %v934_v54 = vstv %s2307_s28 }
  0xce   :  { %v763_v50 = vadd.f32 %v762_v38, %v749_v30  ;;  %v737_v56 = vadd.f32 %v736_v41, %v723_v31  ;;  %v1101_v41 = vstv %s2309_s29 }
  0xd0   :  { %v768_v35 = vmul.f32 %v767_v53, %v763_v50 }
  0xd3   :  { %v750_v44 = vpop.f32.mrf.mxu2 }
  0xd4   :  { %v2302_v46 = vpop.f32.mrf.mxu3  ;;  %v751_v59 = vadd.f32 %v750_v44, %v737_v56 }
  0xe3   :  { %v831_v47 = vpop.f32.mrf.mxu0 }
  0xe4   :  { %v845_v45 = vpop.f32.mrf.mxu1 }
  0xe5   :  { %v846_v10 = vadd.f32 %v845_v45, %v831_v47 }
  0xeb   :  { %v859_v0 = vpop.f32.mrf.mxu2  ;;  %v833_v34 = vpop.f32.mrf.mxu0 }
  0xec   :  { %v873_v1 = vpop.f32.mrf.mxu3  ;;  %v847_v2 = vpop.f32.mrf.mxu1  ;;  %v860_v14 = vadd.f32 %v859_v0, %v846_v10  ;;  %v770_v0 = vadd.f32 %v768_v35, %v220_v62 }
  0xed   :  { %v848_v20 = vadd.f32 %v847_v2, %v833_v34 }
  0xee   :  { %v874_v16 = vadd.f32 %v873_v1, %v860_v14  ;;  %v765_v1 = vadd.f32 %v2302_v46, %v751_v59 }
  0xf3   :  { %v861_v39 = vpop.f32.mrf.mxu2 }
  0xf4   :  { %v875_v3 = vpop.f32.mrf.mxu3  ;;  %v862_v27 = vadd.f32 %v861_v39, %v848_v20 }
  0xf6   :  { %v876_v22 = vadd.f32 %v875_v3, %v862_v27 }
 0x103   :  { %v887_v4 = vpop.f32.mrf.mxu0 }
 0x104   :  { %v901_v5 = vpop.f32.mrf.mxu1  ;;  %v888_v21 = vadd.f32 %v887_v4, %v874_v16 }
 0x106   :  { %v902_v28 = vadd.f32 %v901_v5, %v888_v21  ;;  %v769_v5 = vmul.f32 %v767_v53, %v765_v1 }
 0x10b   :  { %v915_v6 = vpop.f32.mrf.mxu2  ;;  %v889_v8 = vpop.f32.mrf.mxu0 }
 0x10c   :  { %v929_v7 = vpop.f32.mrf.mxu3  ;;  %v903_v9 = vpop.f32.mrf.mxu1  ;;  %v916_v42 = vadd.f32 %v915_v6, %v902_v28  ;;  %v890_v51 = vadd.f32 %v889_v8, %v876_v22  ;;  %v221_v8 = vld [vmem:[%s2333_s4 + $0x8] sm:$0xff] }
 0x10e   :  { %v930_v57 = vadd.f32 %v929_v7, %v916_v42  ;;  %v904_v60 = vadd.f32 %v903_v9, %v890_v51 }
 0x110   :  { %v935_v37 = vmul.f32 %v934_v54, %v930_v57 }
 0x112   :  { %v937_v44 = vadd.f32 %v935_v37, %v770_v0 }
 0x113   :  { %v917_v11 = vpop.f32.mrf.mxu2 }
 0x114   :  { %v931_v12 = vpop.f32.mrf.mxu3  ;;  %v918_v38 = vadd.f32 %v917_v11, %v904_v60 }
 0x116   :  { %v932_v39 = vadd.f32 %v931_v12, %v918_v38 }
 0x118   :  { %v936_v10 = vmul.f32 %v934_v54, %v932_v39 }
 0x123   :  { %v998_v13 = vpop.f32.mrf.mxu0 }
 0x124   :  { %v1012_v15 = vpop.f32.mrf.mxu1 }
 0x125   :  { %v1013_v23 = vadd.f32 %v1012_v15, %v998_v13  ;;  %v771_v13 = vadd.f32 %v769_v5, %v221_v8 }
 0x127   :  { %v938_v14 = vadd.f32 %v936_v10, %v771_v13 }
 0x12b   :  { %v1026_v17 = vpop.f32.mrf.mxu2  ;;  %v1000_v24 = vpop.f32.mrf.mxu0 }
 0x12c   :  { %v1040_v18 = vpop.f32.mrf.mxu3  ;;  %v1014_v26 = vpop.f32.mrf.mxu1  ;;  %v1027_v29 = vadd.f32 %v1026_v17, %v1013_v23 }
 0x12d   :  { %v1015_v48 = vadd.f32 %v1014_v26, %v1000_v24 }
 0x12e   :  { %v1041_v43 = vadd.f32 %v1040_v18, %v1027_v29 }
 0x133   :  { %v1028_v32 = vpop.f32.mrf.mxu2 }
 0x134   :  { %v1042_v33 = vpop.f32.mrf.mxu3  ;;  %v1029_v58 = vadd.f32 %v1028_v32, %v1015_v48 }
 0x136   :  { %v1043_v40 = vadd.f32 %v1042_v33, %v1029_v58 }
 0x143   :  { %v1054_v49 = vpop.f32.mrf.mxu0 }
 0x144   :  { %v1055_v52 = vadd.f32 %v1054_v49, %v1041_v43  ;;  %v1068_v55 = vpop.f32.mrf.mxu1 }
 0x146   :  { %v1069_v61 = vadd.f32 %v1068_v55, %v1055_v52 }
 0x14b   :  { %v1082_v63 = vpop.f32.mrf.mxu2  ;;  %v1056_v45 = vpop.f32.mrf.mxu0 }
 0x14c   :  { %v1096_v36 = vpop.f32.mrf.mxu3  ;;  %v1083_v47 = vadd.f32 %v1082_v63, %v1069_v61  ;;  %v1057_v2 = vadd.f32 %v1056_v45, %v1043_v40  ;;  %v1070_v4 = vpop.f32.mrf.mxu1 }
 0x14e   :  { %v1097_v34 = vadd.f32 %v1096_v36, %v1083_v47  ;;  %v1071_v7 = vadd.f32 %v1070_v4, %v1057_v2 }
 0x150   :  { %v1102_v3 = vmul.f32 %v1101_v41, %v1097_v34 }
 0x152   :  { %v1104_v6 = vadd.f32 %v1102_v3, %v937_v44 }
 0x153   :  { %v1084_v9 = vpop.f32.mrf.mxu2 }
 0x154   :  { %1107 = vst.msk [vmem:[%s2333_s4] sm:$0xff] %vm89_vm0, %v1104_v6  ;;  %v1085_v46 = vadd.f32 %v1084_v9, %v1071_v7  ;;  %v1098_v11 = vpop.f32.mrf.mxu3 }
 0x156   :  { %v1099_v12 = vadd.f32 %v1098_v11, %v1085_v46 }
 0x158   :  { %v1103_v15 = vmul.f32 %v1101_v41, %v1099_v12 }
 0x15a   :  { %v1105_v16 = vadd.f32 %v1103_v15, %v938_v14 }
 0x15c   :  { %1108 = vst.msk [vmem:[%s2333_s4 + $0x8] sm:$0xff] %vm89_vm0, %v1105_v16 }

</bundles_post_ra>
